<compile_context>
chip_gen: v7x
topology: tpu7x:2x2x1
jax: 0.10.0
libtpu: 0.0.40
codegen_flags: <defaults>
</compile_context>

<pallas_src>
import functools

import jax
import jax.numpy as jnp
from jax.experimental import pallas as pl
from jax.experimental.pallas import tpu as pltpu

IN_FEATURES = 256
HIDDEN = 100
LANE = 128
SUBLANE = 8


def _round_up(n, m):
    return ((n + m - 1) // m) * m


def _mlp_kernel(x_ref, w1_ref, b1_ref, w2_ref, b2_ref, o_ref):
    # fc1 + relu: bf16 operands into the MXU, f32 accumulation, f32 elementwise.
    h = jnp.dot(x_ref[...], w1_ref[...], preferred_element_type=jnp.float32)
    h = jnp.maximum(h + b1_ref[...], 0.0)
    # fc2 + relu (padded hidden rows of W2 are exact zeros -> contribute nothing).
    y = jnp.dot(h.astype(jnp.bfloat16), w2_ref[...],
                preferred_element_type=jnp.float32)
    y = jnp.maximum(y + b2_ref[...], 0.0)
    o_ref[...] = y.astype(o_ref.dtype)


def prepare_params(w1, b1, w2, b2):
    """Pad feature dims to lane multiples and cast matmul operands to bf16.

    w1: (256, 100), b1: (100,), w2: (100, F), b2: (F,).  Done once, off the
    hot path.
    """
    f_out = w2.shape[1]
    h_pad = _round_up(HIDDEN, LANE)          # 100 -> 128
    f_pad = _round_up(f_out, LANE)           # e.g. 10 -> 128
    b1 = jnp.reshape(b1, (1, -1)).astype(jnp.float32)
    b2 = jnp.reshape(b2, (1, -1)).astype(jnp.float32)
    w1p = jnp.pad(w1.astype(jnp.float32), ((0, 0), (0, h_pad - HIDDEN)))
    b1p = jnp.pad(b1, ((0, 0), (0, h_pad - HIDDEN)))
    # Rows 100..127 of W2 and padded bias lanes MUST be zero so no garbage
    # reaches the (later sliced) output columns.
    w2p = jnp.pad(w2.astype(jnp.float32),
                  ((0, h_pad - HIDDEN), (0, f_pad - f_out)))
    b2p = jnp.pad(b2, ((0, 0), (0, f_pad - f_out)))
    return (w1p.astype(jnp.bfloat16), b1p,
            w2p.astype(jnp.bfloat16), b2p, f_out)


@functools.partial(jax.jit, static_argnames=("f_out", "batch_tile"))
def _forward_impl(x, w1p, b1p, w2p, b2p, *, f_out, batch_tile):
    b = x.shape[0]
    h_pad = w1p.shape[1]
    f_pad = w2p.shape[1]

    # Batch tile: multiple of 8 sublanes; 128 keeps per-step blocks tiny even
    # for v7x's 64 MiB VMEM while giving double-buffered DMA/compute overlap.
    tb = min(batch_tile, _round_up(b, SUBLANE))
    b_pad = _round_up(b, tb)

    x_p = x.astype(jnp.bfloat16)
    if b_pad != b:
        x_p = jnp.pad(x_p, ((0, b_pad - b), (0, 0)))

    grid = (b_pad // tb,)
    flops = 2 * b_pad * (IN_FEATURES * h_pad + h_pad * f_pad)
    bytes_accessed = (x_p.size * 2 + w1p.size * 2 + w2p.size * 2
                      + b1p.size * 4 + b2p.size * 4 + b_pad * f_pad * 4)

    out = pl.pallas_call(
        _mlp_kernel,
        out_shape=jax.ShapeDtypeStruct((b_pad, f_pad), jnp.float32),
        grid=grid,
        in_specs=[
            pl.BlockSpec((tb, IN_FEATURES), lambda i: (i, 0)),      # x tile
            pl.BlockSpec((IN_FEATURES, h_pad), lambda i: (0, 0)),   # W1 (resident)
            pl.BlockSpec((1, h_pad), lambda i: (0, 0)),             # b1 (resident)
            pl.BlockSpec((h_pad, f_pad), lambda i: (0, 0)),         # W2 (resident)
            pl.BlockSpec((1, f_pad), lambda i: (0, 0)),             # b2 (resident)
        ],
        out_specs=pl.BlockSpec((tb, f_pad), lambda i: (i, 0)),
        compiler_params=pltpu.CompilerParams(
            dimension_semantics=("parallel",),
            vmem_limit_bytes=32 * 1024 * 1024,
        ),
        cost_estimate=pl.CostEstimate(
            flops=flops, transcendentals=0, bytes_accessed=bytes_accessed),
    )(x_p, w1p, b1p, w2p, b2p)

    return out[:b, :f_out]


def network1_forward(x, params, *, batch_tile=128):
    """x: (B, 256) float32. params from prepare_params(). Returns (B, F_out) f32."""
    w1p, b1p, w2p, b2p, f_out = params
    return _forward_impl(x, w1p, b1p, w2p, b2p,
                         f_out=int(f_out), batch_tile=int(batch_tile))


if __name__ == "__main__":
    out_features = 10
    batch = 8

    key = jax.random.PRNGKey(0)
    kx, k1, k2, k3, k4 = jax.random.split(key, 5)

    # nn.Linear-style uniform(-1/sqrt(fan_in), 1/sqrt(fan_in)) init.
    bound1 = 1.0 / jnp.sqrt(256.0)
    bound2 = 1.0 / jnp.sqrt(100.0)
    x = jax.random.normal(kx, (batch, 256), jnp.float32)
    w1 = jax.random.uniform(k1, (256, 100), jnp.float32, -bound1, bound1)
    b1 = jax.random.uniform(k2, (100,), jnp.float32, -bound1, bound1)
    w2 = jax.random.uniform(k3, (100, out_features), jnp.float32, -bound2, bound2)
    b2 = jax.random.uniform(k4, (out_features,), jnp.float32, -bound2, bound2)

    params = prepare_params(w1, b1, w2, b2)
    y = network1_forward(x, params)
    jax.block_until_ready(y)

    # Reference 1: exact bf16-operand / f32-accumulate math (what the MXU does).
    xb = x.astype(jnp.bfloat16).astype(jnp.float32)
    w1b = w1.astype(jnp.bfloat16).astype(jnp.float32)
    w2b = w2.astype(jnp.bfloat16).astype(jnp.float32)
    h_bf = jnp.maximum(xb @ w1b + b1, 0.0)
    y_bf = jnp.maximum(h_bf.astype(jnp.bfloat16).astype(jnp.float32) @ w2b + b2, 0.0)

    # Reference 2: the PyTorch module's pure-f32 math.
    h_f32 = jnp.maximum(x @ w1 + b1, 0.0)
    y_f32 = jnp.maximum(h_f32 @ w2 + b2, 0.0)

    assert y.shape == (batch, out_features)
    assert jnp.allclose(y, y_bf, atol=1e-4, rtol=1e-4), \
        float(jnp.max(jnp.abs(y - y_bf)))
    assert jnp.allclose(y, y_f32, atol=3e-2, rtol=3e-2), \
        float(jnp.max(jnp.abs(y - y_f32)))

    print("KERNEL_OK")
</pallas_src>

<mosaic_0001>
module attributes {stable_mosaic.version = 11 : i64} {
  func.func @_mlp_kernel(%arg0: i32, %arg1: memref<8x256xbf16, #tpu.memory_space<vmem>>, %arg2: memref<256x128xbf16, #tpu.memory_space<vmem>>, %arg3: memref<1x128xf32, #tpu.memory_space<vmem>>, %arg4: memref<128x128xbf16, #tpu.memory_space<vmem>>, %arg5: memref<1x128xf32, #tpu.memory_space<vmem>>, %arg6: memref<8x128xf32, #tpu.memory_space<vmem>>) attributes {dimension_semantics = [#tpu.dimension_semantics<parallel>], iteration_bounds = array<i64: 1>, scalar_prefetch = 0 : i64, scratch_operands = 0 : i64, tpu.core_type = #tpu.core_type<tc>, window_params = [{transform_indices = @transform_0, window_bounds = array<i64: 8, 256>}, {pipeline_mode = #tpu.pipeline_mode<synchronous>, transform_indices = @transform_1, window_bounds = array<i64: 256, 128>}, {pipeline_mode = #tpu.pipeline_mode<synchronous>, transform_indices = @transform_2, window_bounds = array<i64: 1, 128>}, {pipeline_mode = #tpu.pipeline_mode<synchronous>, transform_indices = @transform_3, window_bounds = array<i64: 128, 128>}, {pipeline_mode = #tpu.pipeline_mode<synchronous>, transform_indices = @transform_4, window_bounds = array<i64: 1, 128>}, {transform_indices = @transform_5, window_bounds = array<i64: 8, 128>}]} {
    %c0 = arith.constant 0 : index
    %c0_0 = arith.constant 0 : index
    %0 = vector.load %arg1[%c0, %c0_0] : memref<8x256xbf16, #tpu.memory_space<vmem>>, vector<8x256xbf16>
    %c0_1 = arith.constant 0 : index
    %c0_2 = arith.constant 0 : index
    %1 = vector.load %arg2[%c0_1, %c0_2] : memref<256x128xbf16, #tpu.memory_space<vmem>>, vector<256x128xbf16>
    %cst = arith.constant dense<0.000000e+00> : vector<8x128xf32>
    %2 = tpu.matmul %0, %1, %cst {dimension_numbers = #tpu.dot_dimension_numbers<[1], [0], [0], [1], [0, 0, 1, 1], [], []>} : vector<8x256xbf16>, vector<256x128xbf16>, vector<8x128xf32> -> vector<8x128xf32>
    %c0_3 = arith.constant 0 : index
    %c0_4 = arith.constant 0 : index
    %3 = vector.load %arg3[%c0_3, %c0_4] : memref<1x128xf32, #tpu.memory_space<vmem>>, vector<1x128xf32>
    %4 = vector.broadcast %3 : vector<1x128xf32> to vector<8x128xf32>
    %5 = arith.addf %2, %4 : vector<8x128xf32>
    %cst_5 = arith.constant 0.000000e+00 : f32
    %6 = vector.broadcast %cst_5 : f32 to vector<8x128xf32>
    %7 = arith.maximumf %5, %6 : vector<8x128xf32>
    %8 = arith.truncf %7 : vector<8x128xf32> to vector<8x128xbf16>
    %c0_6 = arith.constant 0 : index
    %c0_7 = arith.constant 0 : index
    %9 = vector.load %arg4[%c0_6, %c0_7] : memref<128x128xbf16, #tpu.memory_space<vmem>>, vector<128x128xbf16>
    %cst_8 = arith.constant dense<0.000000e+00> : vector<8x128xf32>
    %10 = tpu.matmul %8, %9, %cst_8 {dimension_numbers = #tpu.dot_dimension_numbers<[1], [0], [0], [1], [0, 0, 1, 1], [], []>} : vector<8x128xbf16>, vector<128x128xbf16>, vector<8x128xf32> -> vector<8x128xf32>
    %c0_9 = arith.constant 0 : index
    %c0_10 = arith.constant 0 : index
    %11 = vector.load %arg5[%c0_9, %c0_10] : memref<1x128xf32, #tpu.memory_space<vmem>>, vector<1x128xf32>
    %12 = vector.broadcast %11 : vector<1x128xf32> to vector<8x128xf32>
    %13 = arith.addf %10, %12 : vector<8x128xf32>
    %cst_11 = arith.constant 0.000000e+00 : f32
    %14 = vector.broadcast %cst_11 : f32 to vector<8x128xf32>
    %15 = arith.maximumf %13, %14 : vector<8x128xf32>
    %c0_12 = arith.constant 0 : index
    %c0_13 = arith.constant 0 : index
    %16 = vector.load %arg6[%c0_12, %c0_13] : memref<8x128xf32, #tpu.memory_space<vmem>>, vector<8x128xf32>
    tpu.vector_store %arg6[%c0_12, %c0_13], %15 {strides = array<i32>} : memref<8x128xf32, #tpu.memory_space<vmem>>, vector<8x128xf32>,
    return
  }
  func.func @transform_0(%arg0: i32) -> (i32, i32) {
    %c0_i32 = arith.constant 0 : i32
    %c0_i32_0 = arith.constant 0 : i32
    return %arg0, %c0_i32 : i32, i32
  }
  func.func @transform_1(%arg0: i32) -> (i32, i32) {
    %c0_i32 = arith.constant 0 : i32
    %c0_i32_0 = arith.constant 0 : i32
    %c0_i32_1 = arith.constant 0 : i32
    return %c0_i32, %c0_i32_0 : i32, i32
  }
  func.func @transform_2(%arg0: i32) -> (i32, i32) {
    %c0_i32 = arith.constant 0 : i32
    %c0_i32_0 = arith.constant 0 : i32
    %c0_i32_1 = arith.constant 0 : i32
    return %c0_i32, %c0_i32_0 : i32, i32
  }
  func.func @transform_3(%arg0: i32) -> (i32, i32) {
    %c0_i32 = arith.constant 0 : i32
    %c0_i32_0 = arith.constant 0 : i32
    %c0_i32_1 = arith.constant 0 : i32
    return %c0_i32, %c0_i32_0 : i32, i32
  }
  func.func @transform_4(%arg0: i32) -> (i32, i32) {
    %c0_i32 = arith.constant 0 : i32
    %c0_i32_0 = arith.constant 0 : i32
    %c0_i32_1 = arith.constant 0 : i32
    return %c0_i32, %c0_i32_0 : i32, i32
  }
  func.func @transform_5(%arg0: i32) -> (i32, i32) {
    %c0_i32 = arith.constant 0 : i32
    %c0_i32_0 = arith.constant 0 : i32
    return %arg0, %c0_i32 : i32, i32
  }
}

</mosaic_0001>

<bundles_post_ra>
// kernel: _forward_impl.1
= control target key start
LH: loop header
LB: loop body
LE: loop exit
PB: predicated region body
PF: predicated region fallthrough
CT: control target
= control target key end

     0   :  { %10 = vsyncpa [#allocation3], 0  ;;  %s639_s0 = inlined_call_operand.vmem [shape: bf16[8,256], index: 0, kind: input, shape index: {}]   ;;  %s640_s1 = inlined_call_operand.hbm [shape: bf16[256,128], index: 1, kind: input, shape index: {}]   ;;  %s641_s2 = inlined_call_operand.vmem [shape: f32[1,128], index: 2, kind: input, shape index: {}]   ;;  %s642_s3 = inlined_call_operand.hbm [shape: bf16[128,128], index: 3, kind: input, shape index: {}]   ;;  %s643_s4 = inlined_call_operand.vmem [shape: f32[1,128], index: 4, kind: input, shape index: {}]   ;;  %s644_s5 = inlined_call_operand.hbm [shape: f32[8,128], index: 5, kind: output, shape index: {}]  }
   0x1   :  { %11 = vsyncpa [#allocation6], 0 }
   0x2   :  { %12 = vsyncpa [#allocation4], 0  ;;  %s548_s18 = smov [#allocation2]   ;;  %s476_s22 = scalar_lea.hbm %s640_s1, 2048 }
   0x3   :  { %s20_s19 = sshll.u32 %s548_s18, 4  ;;  %p477_p0 = scmp.ne.s32.totalorder %s640_s1, %s476_s22  ;;  %s21_s19 = int_to_ptr.vmem [resolvable:$true] %s20_s19 }
   0x4   :  { %p480_p1 = scmp.lt.u32.totalorder %s476_s22, %s640_s1 }
   0x6   :  { %p482_p2 = pnand %p480_p1, %p477_p0 }
   0x8   :  { %485 = shalt.err (!%p482_p2)
}
   0x9   :  { %s486_s27 = scalar_lea.vmem %s21_s19, 2048  ;;  %p491_p4 = scmp.lt.s32.totalorder %s21_s19, %s21_s19 }
   0xa   :  { %p487_p3 = scmp.ne.s32.totalorder %s21_s19, %s486_s27  ;;  %p492_p5 = scmp.lt.s32.totalorder %s486_s27, %s486_s27 }
   0xc   :  { %p493_p6 = por %p492_p5, %p491_p4 }
   0xe   :  { %p494_p7 = pnand %p493_p6, %p487_p3 }
  0x10   :  { %497 = shalt.err (!%p494_p7)
}
  0x11   :  { %s549_s28 = smov 64   ;;  %s550_s29 = smov 4  }
  0x12   :  { %26 = dma.hbm_to_vmem [thread:$0]  %s640_s1, 2048, %s21_s19, [#allocation3], %s549_s28, %s549_s28, %s550_s29  }
  0x13   :  { %s551_s7 = smov [#allocation5]   ;;  %s498_s11 = scalar_lea.hbm %s642_s3, 1024 }
  0x14   :  { %s34_s8 = sshll.u32 %s551_s7, 4  ;;  %p499_p8 = scmp.ne.s32.totalorder %s642_s3, %s498_s11  ;;  %s35_s8 = int_to_ptr.vmem [resolvable:$true] %s34_s8 }
  0x15   :  { %p502_p9 = scmp.lt.u32.totalorder %s498_s11, %s642_s3 }
  0x17   :  { %p504_p10 = pnand %p502_p9, %p499_p8 }
  0x19   :  { %507 = shalt.err (!%p504_p10)
}
  0x1a   :  { %s508_s16 = scalar_lea.vmem %s35_s8, 1024  ;;  %p513_p12 = scmp.lt.s32.totalorder %s35_s8, %s35_s8 }
  0x1b   :  { %p509_p11 = scmp.ne.s32.totalorder %s35_s8, %s508_s16  ;;  %p514_p13 = scmp.lt.s32.totalorder %s508_s16, %s508_s16 }
  0x1d   :  { %p515_p0 = por %p514_p13, %p513_p12 }
  0x1f   :  { %p516_p1 = pnand %p515_p0, %p509_p11 }
  0x21   :  { %519 = shalt.err (!%p516_p1)
}
  0x22   :  { %40 = dma.hbm_to_vmem [thread:$0]  %s642_s3, 1024, %s35_s8, [#allocation6], %s549_s28, %s549_s28, %s550_s29  }
  0x23   :  { %542 = dma.done.wait [#allocation3], 2048  }
  0x24   :  { %543 = vsyncadd [#allocation3], 4294965248 }
  0x25   :  { %544 = dma.done.wait [#allocation6], 1024  }
  0x26   :  { %545 = vsyncadd [#allocation6], 4294966272  ;;  %v552_v0 = vmov 0.0   ;;  %v450_v1 = vld [vmem:[#allocation2 + $0x40] sm:$0xff]   ;;  %v452_v3 = vld [vmem:[#allocation2 + $0x48] sm:$0xff]   ;;  %vm553_vm0 = vmmov 0  }
  0x27   :  { %423 = vmatprep.subr.bf16.mxu1 %v552_v0  ;;  %v451_v2 = vld [vmem:[#allocation2] sm:$0xff]   ;;  %392 = vmatprep.subr.bf16.mxu0 %v450_v1  ;;  %v453_v4 = vld [vmem:[#allocation2 + $0x8] sm:$0xff]   ;;  %v454_v5 = vld [vmem:[#allocation2 + $0x50] sm:$0xff]   ;;  %s554_s22 = smov [#allocation7]  }
  0x28   :  { %393 = vmatpush3.bf16.msra.mxu0 %v451_v2  ;;  %v455_v6 = vld [vmem:[#allocation2 + $0x10] sm:$0xff]   ;;  %v456_v7 = vld [vmem:[#allocation2 + $0x58] sm:$0xff]   ;;  %v458_v9 = vld [vmem:[#allocation2 + $0x60] sm:$0xff]   ;;  %439 = vmatprep.mubr.msk.bf16.mxu1 %vm553_vm0, %v552_v0  ;;  %s354_s23 = sshll.u32 %s554_s22, 4  ;;  %s355_s23 = int_to_ptr.vmem [resolvable:$true] %s354_s23 }
  0x29   :  { %394 = vmatprep.subr.bf16.mxu0 %v452_v3  ;;  %v457_v8 = vld [vmem:[#allocation2 + $0x18] sm:$0xff]   ;;  %v459_v10 = vld [vmem:[#allocation2 + $0x20] sm:$0xff]   ;;  %v460_v11 = vld [vmem:[#allocation2 + $0x68] sm:$0xff]   ;;  %p525_p3 = scmp.lt.s32.totalorder %s355_s23, %s355_s23 }
  0x2a   :  { %v50_v12 = vld [vmem:[%s639_s0] sm:$0xff]  ;;  %v468_v14 = vld [vmem:[#allocation5] sm:$0xff]   ;;  %v461_v15 = vld [vmem:[#allocation2 + $0x28] sm:$0xff]  }
  0x2b   :  { %v366_v13 = vcombine.high %v50_v12, %v50_v12  ;;  %v462_v16 = vld [vmem:[#allocation2 + $0x70] sm:$0xff]   ;;  %424 = vmatpush3.bf16.msra.mxu1 %v468_v14  ;;  %v469_v17 = vld [vmem:[#allocation5 + $0x8] sm:$0xff]   ;;  %v464_v19 = vld [vmem:[#allocation2 + $0x78] sm:$0xff]   ;;  %v365_v23 = vcombine.low %v50_v12, %v50_v12 }
  0x2c   :  { %395 = vmatpush3.bf16.msra.mxu0 %v453_v4  ;;  %425 = vmatprep.subr.bf16.mxu1 %v552_v0  ;;  %v463_v18 = vld [vmem:[#allocation2 + $0x30] sm:$0xff]   ;;  %v465_v21 = vld [vmem:[#allocation2 + $0x38] sm:$0xff]   ;;  %v472_v24 = vld [vmem:[#allocation5 + $0x20] sm:$0xff]  }
  0x2d   :  { %396 = vmatprep.subr.bf16.mxu0 %v454_v5  ;;  %225 = vmatprep.mubr.bf16.mxu0 %v366_v13  ;;  %v470_v20 = vld [vmem:[#allocation5 + $0x10] sm:$0xff]   ;;  %v471_v22 = vld [vmem:[#allocation5 + $0x18] sm:$0xff]   ;;  %v473_v25 = vld [vmem:[#allocation5 + $0x28] sm:$0xff]  }
  0x2e   :  { %v474_v26 = vld [vmem:[#allocation5 + $0x30] sm:$0xff]   ;;  %v475_v27 = vld [vmem:[#allocation5 + $0x38] sm:$0xff]  }
  0x2f   :  { %426 = vmatpush3.bf16.msra.mxu1 %v469_v17  ;;  %v364_v29 = vld [vmem:[%s641_s2] ss:$0 sm:$0xff]  ;;  %s520_s2 = scalar_lea.vmem %s355_s23, 128 }
  0x30   :  { %397 = vmatpush3.bf16.msra.mxu0 %v455_v6  ;;  %427 = vmatprep.subr.bf16.mxu1 %v552_v0  ;;  %v383_v37 = vld [vmem:[%s643_s4] ss:$0 sm:$0xff]  ;;  %p521_p2 = scmp.ne.s32.totalorder %s355_s23, %s520_s2  ;;  %p526_p4 = scmp.lt.s32.totalorder %s520_s2, %s520_s2 }
  0x31   :  { %398 = vmatprep.subr.bf16.mxu0 %v456_v7 }
  0x32   :  { %p527_p5 = por %p526_p4, %p525_p3 }
  0x33   :  { %428 = vmatpush3.bf16.msra.mxu1 %v470_v20 }
  0x34   :  { %399 = vmatpush3.bf16.msra.mxu0 %v457_v8  ;;  %429 = vmatprep.subr.bf16.mxu1 %v552_v0  ;;  %p528_p6 = pnand %p527_p5, %p521_p2 }
  0x35   :  { %400 = vmatprep.subr.bf16.mxu0 %v458_v9 }
  0x37   :  { %430 = vmatpush3.bf16.msra.mxu1 %v471_v22 }
  0x38   :  { %401 = vmatpush3.bf16.msra.mxu0 %v459_v10  ;;  %431 = vmatprep.subr.bf16.mxu1 %v552_v0 }
  0x39   :  { %402 = vmatprep.subr.bf16.mxu0 %v460_v11 }
  0x3b   :  { %432 = vmatpush3.bf16.msra.mxu1 %v472_v24 }
  0x3c   :  { %403 = vmatpush3.bf16.msra.mxu0 %v461_v15  ;;  %433 = vmatprep.subr.bf16.mxu1 %v552_v0 }
  0x3d   :  { %404 = vmatprep.subr.bf16.mxu0 %v462_v16 }
  0x3f   :  { %434 = vmatpush3.bf16.msra.mxu1 %v473_v25 }
  0x40   :  { %405 = vmatpush3.bf16.msra.mxu0 %v463_v18  ;;  %435 = vmatprep.subr.bf16.mxu1 %v552_v0 }
  0x41   :  { %406 = vmatprep.subr.bf16.mxu0 %v464_v19 }
  0x43   :  { %436 = vmatpush3.bf16.msra.mxu1 %v474_v26 }
  0x44   :  { %407 = vmatpush3.bf16.msra.mxu0 %v465_v21  ;;  %437 = vmatprep.subr.bf16.mxu1 %v552_v0 }
  0x47   :  { %226 = vmatmul.mubr.bf16.vlgmr.msra.gmra.mrb[0].mxu0 %v365_v23  ;;  %438 = vmatpush3.bf16.msra.mxu1 %v475_v27 }
 0x11a   :  { %v408_v28 = vpop.f32.mrb[0].mxu0 }
 0x11b   :  { %v409_v30 = vpop.f32.mrb[1].mxu0 }
 0x11c   :  { %v410_v31 = vadd.f32 %v409_v30, %v408_v28  ;;  %v411_v32 = vpop.f32.mrb[2].mxu0 }
 0x11d   :  { %v412_v33 = vpop.f32.mrb[3].mxu0 }
 0x11e   :  { %v228_v34 = vadd.f32 %v410_v31, %v364_v29 }
 0x120   :  { %v233_v35 = vmax.f32 %v228_v34, 0.0 }
 0x122   :  { %v234_v36 = vpack.c.bf16 %v233_v35, %v233_v35 }
 0x124   :  { %440 = vmatmul.mubr.bf16.vlgmr.msra.gmra.mrb[0].mxu1 %v234_v36 }
 0x1f7   :  { %v340_v38 = vpop.f32.mrb[0].mxu1 }
 0x1f8   :  { %v341_v39 = vadd.f32 %v383_v37, %v340_v38  ;;  %v441_v40 = vpop.f32.mrb[1].mxu1 }
 0x1f9   :  { %v343_v41 = vpop.f32.mrb[2].mxu1 }
 0x1fa   :  { %v346_v42 = vmax.f32 %v341_v39, 0.0  ;;  %v442_v43 = vpop.f32.mrb[3].mxu1 }
 0x1fc   :  { %347 = vst [vmem:[#allocation7] sm:$0xff] %v346_v42 }
 0x1fd   :  { %531 = shalt.err (!%p528_p6)
}
 0x1fe   :  { %s532_s4 = scalar_lea.hbm %s644_s5, 128 }
 0x1ff   :  { %p533_p7 = scmp.ne.s32.totalorder %s644_s5, %s532_s4  ;;  %p536_p8 = scmp.lt.u32.totalorder %s532_s4, %s644_s5 }
 0x201   :  { %p538_p9 = pnand %p536_p8, %p533_p7 }
 0x203   :  { %541 = shalt.err (!%p538_p9)
}
 0x204   :  { %357 = dma.vmem_to_hbm [thread:$0]  %s355_s23, 128, %s644_s5, [#allocation4]  }
 0x205   :  { %546 = dma.done.wait [#allocation4], 128  }
 0x206   :  { %547 = vsyncadd [#allocation4], 4294967168 }
 0x207   :  { %361 = vsyncpa [#allocation3], 1 }
 0x208   :  { %362 = vsyncpa [#allocation6], 1 }
 0x209   :  { %363 = vsyncpa [#allocation4], 1 }

</bundles_post_ra>
